<compile_context>
chip_gen: v7x
topology: tpu7x:2x2x1
jax: 0.10.0
libtpu: 0.0.40
codegen_flags: <defaults>
</compile_context>

<pallas_src>
import functools

import jax
import jax.numpy as jnp
from jax.experimental import pallas as pl
from jax.experimental.pallas import tpu as pltpu


def _mlp_kernel(H, x_ref, p_ref, o_ref):
    """Fused Linear(1->H) -> ReLU -> Linear(H->1), batch on the lane axis.

    x_ref: (1, Npad) f32 in VMEM  -- batch, lane-dense
    p_ref: (3H + 1,) f32 in SMEM  -- packed [w1(H), b1(H), w2(H), b2(1)]
    o_ref: (1, Npad) f32 in VMEM
    """
    x = x_ref[...]
    acc = jnp.zeros_like(x)
    # H is tiny (10): fully unrolled at trace time; each step is one scalar
    # splat from SMEM plus a handful of VPU ops on two vregs.
    for h in range(H):
        w1 = p_ref[h]
        b1 = p_ref[H + h]
        w2 = p_ref[2 * H + h]
        acc = acc + w2 * jnp.maximum(w1 * x + b1, 0.0)
    o_ref[...] = (acc + p_ref[3 * H]).astype(o_ref.dtype)


def make_net_forward(n_hidden, n_batch):
    """Builds a jitted forward fn: (x_flat (N,), params (3H+1,)) -> y_flat (N,)."""
    H = n_hidden
    N = n_batch
    n_pad = ((N + 127) // 128) * 128        # lane-dense, unmasked stores

    call = pl.pallas_call(
        functools.partial(_mlp_kernel, H),
        out_shape=jax.ShapeDtypeStruct((1, n_pad), jnp.float32),
        in_specs=[
            pl.BlockSpec(memory_space=pltpu.MemorySpace.VMEM),   # x row
            pl.BlockSpec(memory_space=pltpu.MemorySpace.SMEM),   # packed params
        ],
        out_specs=pl.BlockSpec(memory_space=pltpu.MemorySpace.VMEM),
        cost_estimate=pl.CostEstimate(
            flops=5 * H * n_pad,
            transcendentals=0,
            bytes_accessed=4 * (2 * n_pad + 3 * H + 1),
        ),
    )

    @jax.jit
    def forward(x_flat, params):
        x_row = jnp.pad(x_flat, (0, n_pad - N)).reshape(1, n_pad)
        y_row = call(x_row, params)
        return y_row[0, :N]                 # drop padded lanes

    return forward


def pack_params(w1, b1, w2, b2):
    """Flatten (1,H), (1,H), (H,1), (1,1) params into one (3H+1,) SMEM vector."""
    return jnp.concatenate(
        [w1.reshape(-1), b1.reshape(-1), w2.reshape(-1), b2.reshape(-1)]
    ).astype(jnp.float32)


def init_params(key, n_feature, n_hidden, n_output, dtype=jnp.float32):
    """torch.nn.Linear-style U(-1/sqrt(fan_in), 1/sqrt(fan_in)) init."""
    k1, k2, k3, k4 = jax.random.split(key, 4)
    bound1 = 1.0 / (n_feature ** 0.5)
    bound2 = 1.0 / (n_hidden ** 0.5)
    # stored transposed vs. torch: (in_features, out_features)
    w1 = jax.random.uniform(k1, (n_feature, n_hidden), dtype, -bound1, bound1)
    b1 = jax.random.uniform(k2, (1, n_hidden), dtype, -bound1, bound1)
    w2 = jax.random.uniform(k3, (n_hidden, n_output), dtype, -bound2, bound2)
    b2 = jax.random.uniform(k4, (1, n_output), dtype, -bound2, bound2)
    return w1, b1, w2, b2


if __name__ == "__main__":
    # Shapes from the original script:
    #   x = linspace(-1, 1, 200).unsqueeze(1) -> (200, 1); Net(1, 10, 1)
    N, n_feature, n_hidden, n_output = 200, 1, 10, 1

    x_flat = jnp.linspace(-1.0, 1.0, N, dtype=jnp.float32)   # lane-dense batch
    w1, b1, w2, b2 = init_params(jax.random.PRNGKey(0),
                                 n_feature, n_hidden, n_output)
    params = pack_params(w1, b1, w2, b2)

    forward = make_net_forward(n_hidden, N)
    y_flat = jax.block_until_ready(forward(x_flat, params))

    # PyTorch-convention result and pure-JAX reference of the same forward.
    y = y_flat.reshape(N, n_output)
    x_col = x_flat.reshape(N, 1)
    y_ref = jnp.maximum(x_col @ w1 + b1, 0.0) @ w2 + b2
    assert y.shape == (N, n_output)
    assert jnp.allclose(y, y_ref, atol=1e-5, rtol=1e-5)

    print("KERNEL_OK")
</pallas_src>

<mosaic_0001>
module attributes {stable_mosaic.version = 11 : i64} {
  func.func @_mlp_kernel(%arg0: memref<1x256xf32, #tpu.memory_space<vmem>>, %arg1: memref<31xf32, #tpu.memory_space<smem>>, %arg2: memref<1x256xf32, #tpu.memory_space<vmem>>) attributes {dimension_semantics = [], scalar_prefetch = 0 : i64, scratch_operands = 0 : i64, tpu.core_type = #tpu.core_type<tc>} {
    %c0 = arith.constant 0 : index
    %c0_0 = arith.constant 0 : index
    %0 = vector.load %arg0[%c0, %c0_0] : memref<1x256xf32, #tpu.memory_space<vmem>>, vector<1x256xf32>
    %cst = arith.constant 0.000000e+00 : f32
    %1 = vector.broadcast %cst : f32 to vector<1x256xf32>
    %c0_1 = arith.constant 0 : index
    %2 = memref.load %arg1[%c0_1] : memref<31xf32, #tpu.memory_space<smem>>
    %c10 = arith.constant 10 : index
    %3 = memref.load %arg1[%c10] : memref<31xf32, #tpu.memory_space<smem>>
    %c20 = arith.constant 20 : index
    %4 = memref.load %arg1[%c20] : memref<31xf32, #tpu.memory_space<smem>>
    %5 = vector.broadcast %2 : f32 to vector<1x256xf32>
    %6 = arith.mulf %5, %0 : vector<1x256xf32>
    %7 = vector.broadcast %3 : f32 to vector<1x256xf32>
    %8 = arith.addf %6, %7 : vector<1x256xf32>
    %cst_2 = arith.constant 0.000000e+00 : f32
    %9 = vector.broadcast %cst_2 : f32 to vector<1x256xf32>
    %10 = arith.maximumf %8, %9 : vector<1x256xf32>
    %11 = vector.broadcast %4 : f32 to vector<1x256xf32>
    %12 = arith.mulf %11, %10 : vector<1x256xf32>
    %13 = arith.addf %1, %12 : vector<1x256xf32>
    %c1 = arith.constant 1 : index
    %14 = memref.load %arg1[%c1] : memref<31xf32, #tpu.memory_space<smem>>
    %c11 = arith.constant 11 : index
    %15 = memref.load %arg1[%c11] : memref<31xf32, #tpu.memory_space<smem>>
    %c21 = arith.constant 21 : index
    %16 = memref.load %arg1[%c21] : memref<31xf32, #tpu.memory_space<smem>>
    %17 = vector.broadcast %14 : f32 to vector<1x256xf32>
    %18 = arith.mulf %17, %0 : vector<1x256xf32>
    %19 = vector.broadcast %15 : f32 to vector<1x256xf32>
    %20 = arith.addf %18, %19 : vector<1x256xf32>
    %cst_3 = arith.constant 0.000000e+00 : f32
    %21 = vector.broadcast %cst_3 : f32 to vector<1x256xf32>
    %22 = arith.maximumf %20, %21 : vector<1x256xf32>
    %23 = vector.broadcast %16 : f32 to vector<1x256xf32>
    %24 = arith.mulf %23, %22 : vector<1x256xf32>
    %25 = arith.addf %13, %24 : vector<1x256xf32>
    %c2 = arith.constant 2 : index
    %26 = memref.load %arg1[%c2] : memref<31xf32, #tpu.memory_space<smem>>
    %c12 = arith.constant 12 : index
    %27 = memref.load %arg1[%c12] : memref<31xf32, #tpu.memory_space<smem>>
    %c22 = arith.constant 22 : index
    %28 = memref.load %arg1[%c22] : memref<31xf32, #tpu.memory_space<smem>>
    %29 = vector.broadcast %26 : f32 to vector<1x256xf32>
    %30 = arith.mulf %29, %0 : vector<1x256xf32>
    %31 = vector.broadcast %27 : f32 to vector<1x256xf32>
    %32 = arith.addf %30, %31 : vector<1x256xf32>
    %cst_4 = arith.constant 0.000000e+00 : f32
    %33 = vector.broadcast %cst_4 : f32 to vector<1x256xf32>
    %34 = arith.maximumf %32, %33 : vector<1x256xf32>
    %35 = vector.broadcast %28 : f32 to vector<1x256xf32>
    %36 = arith.mulf %35, %34 : vector<1x256xf32>
    %37 = arith.addf %25, %36 : vector<1x256xf32>
    %c3 = arith.constant 3 : index
    %38 = memref.load %arg1[%c3] : memref<31xf32, #tpu.memory_space<smem>>
    %c13 = arith.constant 13 : index
    %39 = memref.load %arg1[%c13] : memref<31xf32, #tpu.memory_space<smem>>
    %c23 = arith.constant 23 : index
    %40 = memref.load %arg1[%c23] : memref<31xf32, #tpu.memory_space<smem>>
    %41 = vector.broadcast %38 : f32 to vector<1x256xf32>
    %42 = arith.mulf %41, %0 : vector<1x256xf32>
    %43 = vector.broadcast %39 : f32 to vector<1x256xf32>
    %44 = arith.addf %42, %43 : vector<1x256xf32>
    %cst_5 = arith.constant 0.000000e+00 : f32
    %45 = vector.broadcast %cst_5 : f32 to vector<1x256xf32>
    %46 = arith.maximumf %44, %45 : vector<1x256xf32>
    %47 = vector.broadcast %40 : f32 to vector<1x256xf32>
    %48 = arith.mulf %47, %46 : vector<1x256xf32>
    %49 = arith.addf %37, %48 : vector<1x256xf32>
    %c4 = arith.constant 4 : index
    %50 = memref.load %arg1[%c4] : memref<31xf32, #tpu.memory_space<smem>>
    %c14 = arith.constant 14 : index
    %51 = memref.load %arg1[%c14] : memref<31xf32, #tpu.memory_space<smem>>
    %c24 = arith.constant 24 : index
    %52 = memref.load %arg1[%c24] : memref<31xf32, #tpu.memory_space<smem>>
    %53 = vector.broadcast %50 : f32 to vector<1x256xf32>
    %54 = arith.mulf %53, %0 : vector<1x256xf32>
    %55 = vector.broadcast %51 : f32 to vector<1x256xf32>
    %56 = arith.addf %54, %55 : vector<1x256xf32>
    %cst_6 = arith.constant 0.000000e+00 : f32
    %57 = vector.broadcast %cst_6 : f32 to vector<1x256xf32>
    %58 = arith.maximumf %56, %57 : vector<1x256xf32>
    %59 = vector.broadcast %52 : f32 to vector<1x256xf32>
    %60 = arith.mulf %59, %58 : vector<1x256xf32>
    %61 = arith.addf %49, %60 : vector<1x256xf32>
    %c5 = arith.constant 5 : index
    %62 = memref.load %arg1[%c5] : memref<31xf32, #tpu.memory_space<smem>>
    %c15 = arith.constant 15 : index
    %63 = memref.load %arg1[%c15] : memref<31xf32, #tpu.memory_space<smem>>
    %c25 = arith.constant 25 : index
    %64 = memref.load %arg1[%c25] : memref<31xf32, #tpu.memory_space<smem>>
    %65 = vector.broadcast %62 : f32 to vector<1x256xf32>
    %66 = arith.mulf %65, %0 : vector<1x256xf32>
    %67 = vector.broadcast %63 : f32 to vector<1x256xf32>
    %68 = arith.addf %66, %67 : vector<1x256xf32>
    %cst_7 = arith.constant 0.000000e+00 : f32
    %69 = vector.broadcast %cst_7 : f32 to vector<1x256xf32>
    %70 = arith.maximumf %68, %69 : vector<1x256xf32>
    %71 = vector.broadcast %64 : f32 to vector<1x256xf32>
    %72 = arith.mulf %71, %70 : vector<1x256xf32>
    %73 = arith.addf %61, %72 : vector<1x256xf32>
    %c6 = arith.constant 6 : index
    %74 = memref.load %arg1[%c6] : memref<31xf32, #tpu.memory_space<smem>>
    %c16 = arith.constant 16 : index
    %75 = memref.load %arg1[%c16] : memref<31xf32, #tpu.memory_space<smem>>
    %c26 = arith.constant 26 : index
    %76 = memref.load %arg1[%c26] : memref<31xf32, #tpu.memory_space<smem>>
    %77 = vector.broadcast %74 : f32 to vector<1x256xf32>
    %78 = arith.mulf %77, %0 : vector<1x256xf32>
    %79 = vector.broadcast %75 : f32 to vector<1x256xf32>
    %80 = arith.addf %78, %79 : vector<1x256xf32>
    %cst_8 = arith.constant 0.000000e+00 : f32
    %81 = vector.broadcast %cst_8 : f32 to vector<1x256xf32>
    %82 = arith.maximumf %80, %81 : vector<1x256xf32>
    %83 = vector.broadcast %76 : f32 to vector<1x256xf32>
    %84 = arith.mulf %83, %82 : vector<1x256xf32>
    %85 = arith.addf %73, %84 : vector<1x256xf32>
    %c7 = arith.constant 7 : index
    %86 = memref.load %arg1[%c7] : memref<31xf32, #tpu.memory_space<smem>>
    %c17 = arith.constant 17 : index
    %87 = memref.load %arg1[%c17] : memref<31xf32, #tpu.memory_space<smem>>
    %c27 = arith.constant 27 : index
    %88 = memref.load %arg1[%c27] : memref<31xf32, #tpu.memory_space<smem>>
    %89 = vector.broadcast %86 : f32 to vector<1x256xf32>
    %90 = arith.mulf %89, %0 : vector<1x256xf32>
    %91 = vector.broadcast %87 : f32 to vector<1x256xf32>
    %92 = arith.addf %90, %91 : vector<1x256xf32>
    %cst_9 = arith.constant 0.000000e+00 : f32
    %93 = vector.broadcast %cst_9 : f32 to vector<1x256xf32>
    %94 = arith.maximumf %92, %93 : vector<1x256xf32>
    %95 = vector.broadcast %88 : f32 to vector<1x256xf32>
    %96 = arith.mulf %95, %94 : vector<1x256xf32>
    %97 = arith.addf %85, %96 : vector<1x256xf32>
    %c8 = arith.constant 8 : index
    %98 = memref.load %arg1[%c8] : memref<31xf32, #tpu.memory_space<smem>>
    %c18 = arith.constant 18 : index
    %99 = memref.load %arg1[%c18] : memref<31xf32, #tpu.memory_space<smem>>
    %c28 = arith.constant 28 : index
    %100 = memref.load %arg1[%c28] : memref<31xf32, #tpu.memory_space<smem>>
    %101 = vector.broadcast %98 : f32 to vector<1x256xf32>
    %102 = arith.mulf %101, %0 : vector<1x256xf32>
    %103 = vector.broadcast %99 : f32 to vector<1x256xf32>
    %104 = arith.addf %102, %103 : vector<1x256xf32>
    %cst_10 = arith.constant 0.000000e+00 : f32
    %105 = vector.broadcast %cst_10 : f32 to vector<1x256xf32>
    %106 = arith.maximumf %104, %105 : vector<1x256xf32>
    %107 = vector.broadcast %100 : f32 to vector<1x256xf32>
    %108 = arith.mulf %107, %106 : vector<1x256xf32>
    %109 = arith.addf %97, %108 : vector<1x256xf32>
    %c9 = arith.constant 9 : index
    %110 = memref.load %arg1[%c9] : memref<31xf32, #tpu.memory_space<smem>>
    %c19 = arith.constant 19 : index
    %111 = memref.load %arg1[%c19] : memref<31xf32, #tpu.memory_space<smem>>
    %c29 = arith.constant 29 : index
    %112 = memref.load %arg1[%c29] : memref<31xf32, #tpu.memory_space<smem>>
    %113 = vector.broadcast %110 : f32 to vector<1x256xf32>
    %114 = arith.mulf %113, %0 : vector<1x256xf32>
    %115 = vector.broadcast %111 : f32 to vector<1x256xf32>
    %116 = arith.addf %114, %115 : vector<1x256xf32>
    %cst_11 = arith.constant 0.000000e+00 : f32
    %117 = vector.broadcast %cst_11 : f32 to vector<1x256xf32>
    %118 = arith.maximumf %116, %117 : vector<1x256xf32>
    %119 = vector.broadcast %112 : f32 to vector<1x256xf32>
    %120 = arith.mulf %119, %118 : vector<1x256xf32>
    %121 = arith.addf %109, %120 : vector<1x256xf32>
    %c30 = arith.constant 30 : index
    %122 = memref.load %arg1[%c30] : memref<31xf32, #tpu.memory_space<smem>>
    %123 = vector.broadcast %122 : f32 to vector<1x256xf32>
    %124 = arith.addf %121, %123 : vector<1x256xf32>
    %c0_12 = arith.constant 0 : index
    %c0_13 = arith.constant 0 : index
    %125 = vector.load %arg2[%c0_12, %c0_13] : memref<1x256xf32, #tpu.memory_space<vmem>>, vector<1x256xf32>
    tpu.vector_store %arg2[%c0_12, %c0_13], %124 {strides = array<i32>} : memref<1x256xf32, #tpu.memory_space<vmem>>, vector<1x256xf32>,
    return
  }
}

</mosaic_0001>

<bundles_post_ra>
// kernel: forward.1
= control target key start
LH: loop header
LB: loop body
LE: loop exit
PB: predicated region body
PF: predicated region fallthrough
CT: control target
= control target key end

     0   :  { %7 = vsyncpa [#allocation4], 0  ;;  %s348_s0 = inlined_call_operand.vmem [shape: f32[1,256], index: 0, kind: input, shape index: {}]   ;;  %s349_s1 = inlined_call_operand.vmem [shape: f32[31], index: 1, kind: input, shape index: {}]   ;;  %s350_s2 = inlined_call_operand.hbm [shape: f32[1,256], index: 2, kind: output, shape index: {}]  }
   0x1   :  { %8 = vsyncpa [#allocation3], 0  ;;  %s17_s11 = sshll.u32 %s349_s1, 4  ;;  %s18_s11 = int_to_ptr.vmem [resolvable:$true] %s17_s11 }
   0x2   :  { %s191_s12 = scalar_lea.vmem %s18_s11, 16  ;;  %p196_p1 = scmp.lt.s32.totalorder %s18_s11, %s18_s11 }
   0x3   :  { %p192_p0 = scmp.ne.s32.totalorder %s18_s11, %s191_s12  ;;  %p197_p2 = scmp.lt.s32.totalorder %s191_s12, %s191_s12 }
   0x5   :  { %p198_p3 = por %p197_p2, %p196_p1 }
   0x7   :  { %p199_p4 = pnand %p198_p3, %p192_p0 }
   0x9   :  { %202 = shalt.err (!%p199_p4)
}
   0xa   :  { %s229_s13 = smov [#allocation2]  }
   0xb   :  { %20 = dma.vmem_to_smem %s18_s11, 16, %s229_s13, [#allocation4]  }
   0xc   :  { %225 = dma.done.wait [#allocation4], 16  }
   0xd   :  { %226 = vsyncadd [#allocation4], 4294967280 }
   0xe   :  { %24 = sfence }
   0xf   :  { %s26_s14 = sld [smem:[#allocation2]]  ;;  %s159_s15 = sld [smem:[#allocation2 + $0xa]]  ;;  %v258_v0 = vld [vmem:[%s348_s0] sm:$0x3] }
  0x10   :  { %s249_s16 = sld [smem:[#allocation2 + $0x14]]  ;;  %s161_s17 = sld [smem:[#allocation2 + $0x1]] }
  0x11   :  { %s162_s18 = sld [smem:[#allocation2 + $0xb]]  ;;  %s251_s1 = sld [smem:[#allocation2 + $0x15]] }
  0x12   :  { %s164_s19 = sld [smem:[#allocation2 + $0x2]]  ;;  %s253_s20 = sld [smem:[#allocation2 + $0xc]] }
  0x13   :  { %s260_s23 = sld [smem:[#allocation2 + $0x16]]  ;;  %s167_s24 = sld [smem:[#allocation2 + $0x3]] }
  0x14   :  { %s262_s25 = sld [smem:[#allocation2 + $0xd]]  ;;  %s264_s26 = sld [smem:[#allocation2 + $0x17]] }
  0x15   :  { %v29_v1 = vstv %s26_s14  ;;  %v31_v2 = vstv %s159_s15  ;;  %s266_s27 = sld [smem:[#allocation2 + $0x4]]  ;;  %s268_s28 = sld [smem:[#allocation2 + $0xe]] }
  0x16   :  { %v30_v3 = vmul.f32 %v29_v1, %v258_v0  ;;  %v40_v4 = vstv %s161_s17  ;;  %s271_s0 = sld [smem:[#allocation2 + $0x18]]  ;;  %s273_s29 = sld [smem:[#allocation2 + $0x5]]  ;;  %v34_v8 = vstv %s249_s16 }
  0x17   :  { %v41_v5 = vmul.f32 %v40_v4, %v258_v0  ;;  %v42_v6 = vstv %s162_s18  ;;  %s276_s30 = sld [smem:[#allocation2 + $0xf]]  ;;  %s280_s3 = sld [smem:[#allocation2 + $0x6]]  ;;  %v45_v12 = vstv %s251_s1 }
  0x18   :  { %v32_v7 = vadd.f32 %v31_v2, %v30_v3  ;;  %v51_v9 = vstv %s164_s19  ;;  %v53_v10 = vstv %s253_s20  ;;  %s282_s4 = sld [smem:[#allocation2 + $0x10]]  ;;  %s286_s5 = sld [smem:[#allocation2 + $0x19]] }
  0x19   :  { %v43_v11 = vadd.f32 %v42_v6, %v41_v5  ;;  %v52_v13 = vmul.f32 %v51_v9, %v258_v0  ;;  %v62_v14 = vstv %s167_s24  ;;  %s288_s6 = sld [smem:[#allocation2 + $0x7]]  ;;  %v56_v16 = vstv %s260_s23  ;;  %s293_s7 = sld [smem:[#allocation2 + $0x1a]] }
  0x1a   :  { %v33_v15 = vmax.f32 %v32_v7, 0.0  ;;  %v63_v17 = vmul.f32 %v62_v14, %v258_v0  ;;  %v64_v18 = vstv %s262_s25  ;;  %s295_s8 = sld [smem:[#allocation2 + $0x11]]  ;;  %s299_s9 = sld [smem:[#allocation2 + $0x8]]  ;;  %v67_v25 = vstv %s264_s26 }
  0x1b   :  { %v44_v19 = vmax.f32 %v43_v11, 0.0  ;;  %v54_v20 = vadd.f32 %v53_v10, %v52_v13  ;;  %v73_v21 = vstv %s266_s27  ;;  %v75_v22 = vstv %s268_s28  ;;  %s301_s10 = sld [smem:[#allocation2 + $0x12]]  ;;  %s305_s11 = sld [smem:[#allocation2 + $0x1b]] }
  0x1c   :  { %v35_v23 = vmul.f32 %v34_v8, %v33_v15  ;;  %v65_v24 = vadd.f32 %v64_v18, %v63_v17  ;;  %v74_v26 = vmul.f32 %v73_v21, %v258_v0  ;;  %v84_v29 = vstv %s273_s29  ;;  %s309_s12 = sld [smem:[#allocation2 + $0x9]]  ;;  %s311_s13 = sld [smem:[#allocation2 + $0x13]] }
  0x1d   :  { %v46_v27 = vmul.f32 %v45_v12, %v44_v19  ;;  %v55_v28 = vmax.f32 %v54_v20, 0.0  ;;  %v86_v30 = vstv %s276_s30  ;;  %v78_v33 = vstv %s271_s0  ;;  %s317_s14 = sld [smem:[#allocation2 + $0x1c]]  ;;  %s323_s15 = sld [smem:[#allocation2 + $0x1d]] }
  0x1e   :  { %v66_v31 = vmax.f32 %v65_v24, 0.0  ;;  %v76_v32 = vadd.f32 %v75_v22, %v74_v26  ;;  %v85_v34 = vmul.f32 %v84_v29, %v258_v0  ;;  %v95_v37 = vstv %s280_s3  ;;  %s188_s16 = sld [smem:[#allocation2 + $0x1e]]  ;;  %s230_s17 = smov [#allocation5]  }
  0x1f   :  { %v47_v35 = vadd.f32 %v46_v27, %v35_v23  ;;  %v57_v36 = vmul.f32 %v56_v16, %v55_v28  ;;  %v97_v38 = vstv %s282_s4  ;;  %v96_v42 = vmul.f32 %v95_v37, %v258_v0  ;;  %s150_s18 = sshll.u32 %s230_s17, 4  ;;  %s151_s18 = int_to_ptr.vmem [resolvable:$true] %s150_s18 }
  0x20   :  { %v68_v39 = vmul.f32 %v67_v25, %v66_v31  ;;  %v77_v40 = vmax.f32 %v76_v32, 0.0  ;;  %v87_v41 = vadd.f32 %v86_v30, %v85_v34  ;;  %v89_v44 = vstv %s286_s5  ;;  %s203_s1 = scalar_lea.vmem %s151_s18, 32  ;;  %p208_p6 = scmp.lt.s32.totalorder %s151_s18, %s151_s18 }
  0x21   :  { %v58_v43 = vadd.f32 %v57_v36, %v47_v35  ;;  %v106_v45 = vstv %s288_s6  ;;  %v108_v46 = vstv %s295_s8  ;;  %v98_v49 = vadd.f32 %v97_v38, %v96_v42  ;;  %p204_p5 = scmp.ne.s32.totalorder %s151_s18, %s203_s1  ;;  %p209_p7 = scmp.lt.s32.totalorder %s203_s1, %s203_s1 }
  0x22   :  { %v79_v47 = vmul.f32 %v78_v33, %v77_v40  ;;  %v88_v48 = vmax.f32 %v87_v41, 0.0  ;;  %v107_v50 = vmul.f32 %v106_v45, %v258_v0  ;;  %v100_v52 = vstv %s293_s7 }
  0x23   :  { %v69_v51 = vadd.f32 %v68_v39, %v58_v43  ;;  %v117_v53 = vstv %s299_s9  ;;  %v119_v54 = vstv %s301_s10  ;;  %v99_v56 = vmax.f32 %v98_v49, 0.0  ;;  %p210_p8 = por %p209_p7, %p208_p6 }
  0x24   :  { %v90_v55 = vmul.f32 %v89_v44, %v88_v48  ;;  %v109_v57 = vadd.f32 %v108_v46, %v107_v50  ;;  %v118_v58 = vmul.f32 %v117_v53, %v258_v0  ;;  %v111_v60 = vstv %s305_s11 }
  0x25   :  { %v80_v59 = vadd.f32 %v79_v47, %v69_v51  ;;  %v128_v61 = vstv %s309_s12  ;;  %v130_v62 = vstv %s311_s13  ;;  %v101_v63 = vmul.f32 %v100_v52, %v99_v56  ;;  %p211_p9 = pnand %p210_p8, %p204_p5 }
  0x26   :  { %v110_v1 = vmax.f32 %v109_v57, 0.0  ;;  %v120_v2 = vadd.f32 %v119_v54, %v118_v58  ;;  %v129_v3 = vmul.f32 %v128_v61, %v258_v0  ;;  %v122_v5 = vstv %s317_s14 }
  0x27   :  { %v91_v4 = vadd.f32 %v90_v55, %v80_v59  ;;  %v133_v10 = vstv %s323_s15  ;;  %v139_v15 = vlaneseq  ;;  %v137_v17 = vstv %s188_s16 }
  0x28   :  { %v112_v6 = vmul.f32 %v111_v60, %v110_v1  ;;  %v121_v7 = vmax.f32 %v120_v2, 0.0  ;;  %v131_v8 = vadd.f32 %v130_v62, %v129_v3 }
  0x29   :  { %v102_v9 = vadd.f32 %v101_v63, %v91_v4  ;;  %vm141_vm0 = vcmp.lt.s32.totalorder %v139_v15, 256 }
  0x2a   :  { %v123_v11 = vmul.f32 %v122_v5, %v121_v7  ;;  %v132_v12 = vmax.f32 %v131_v8, 0.0 }
  0x2b   :  { %v113_v13 = vadd.f32 %v112_v6, %v102_v9 }
  0x2c   :  { %v134_v14 = vmul.f32 %v133_v10, %v132_v12 }
  0x2d   :  { %v124_v16 = vadd.f32 %v123_v11, %v113_v13 }
  0x2f   :  { %v135_v18 = vadd.f32 %v134_v14, %v124_v16 }
  0x31   :  { %v138_v0 = vadd.f32 %v137_v17, %v135_v18 }
  0x33   :  { %143 = vst.msk [vmem:[#allocation5] sm:$0x3] %vm141_vm0, %v138_v0 }
  0x34   :  { %214 = shalt.err (!%p211_p9)
}
  0x35   :  { %s215_s21 = scalar_lea.hbm %s350_s2, 32 }
  0x36   :  { %p216_p10 = scmp.ne.s32.totalorder %s350_s2, %s215_s21  ;;  %p219_p11 = scmp.lt.u32.totalorder %s215_s21, %s350_s2 }
  0x38   :  { %p221_p12 = pnand %p219_p11, %p216_p10 }
  0x3a   :  { %224 = shalt.err (!%p221_p12)
}
  0x3b   :  { %153 = dma.vmem_to_hbm [thread:$0]  %s151_s18, 32, %s350_s2, [#allocation3]  }
  0x3c   :  { %227 = dma.done.wait [#allocation3], 32  }
  0x3d   :  { %228 = vsyncadd [#allocation3], 4294967264 }
  0x3e   :  { %157 = vsyncpa [#allocation3], 1 }
  0x3f   :  { %158 = vsyncpa [#allocation4], 1 }

</bundles_post_ra>
